<compile_context>
chip_gen: v6e
topology: v6e:2x2x1
jax: 0.10.0
libtpu: 0.0.40
codegen_flags: <defaults>
</compile_context>

<pallas_src>
import jax
import jax.numpy as jnp
from jax import lax
from jax.experimental import pallas as pl
from jax.experimental.pallas import tpu as pltpu

HIDDEN = 64
KSIZE = 3


def convlstm_kernel(xc_ref, w1_ref, b1_ref, w2_ref, b2_ref, out_ref):
    # xc_ref : (TB, L, K*Cin)  im2col'd x (k=3, pad=1), MXU dtype
    # w1_ref : (K*Cin, 3H)     LSTM conv weights, x-columns only, i/o/g rows only
    # b1_ref : (1, 3H)         f32 bias (i/o/g)
    # w2_ref : (H, K)          output conv weights
    # b2_ref : (1, 1)          f32 scalar bias in SMEM
    # out_ref: (TB, L)         f32, lane-dense (L on lanes)
    TB, L, KC = xc_ref.shape
    H = HIDDEN

    x = xc_ref[...].reshape(TB * L, KC)

    # Conv1d(Cin+H -> 4H, k=3, pad=1) on cat([x, h0]) with h0 == 0 collapses to
    # one im2col matmul over x only; forget-gate columns dropped (c0 == 0).
    acc = jnp.dot(x, w1_ref[...], preferred_element_type=jnp.float32)
    acc = acc + b1_ref[...]                                   # (TB*L, 3H) f32

    def _sigmoid(v):                     # one EUP tanh instead of exp + recip
        return 0.5 * jnp.tanh(0.5 * v) + 0.5

    gi = _sigmoid(acc[:, 0 * H:1 * H])
    go = _sigmoid(acc[:, 1 * H:2 * H])
    gg = jnp.tanh(acc[:, 2 * H:3 * H])

    c_next = gi * gg                     # f * c_prev == 0 by construction
    h_next = go * jnp.tanh(c_next)       # (TB*L, H) f32

    # Output Conv1d(H -> 1, k=3, pad=1): one small MXU matmul gives the three
    # per-tap contributions; combine them with static +/-1 shifts along L.
    s = jnp.dot(h_next.astype(w2_ref.dtype), w2_ref[...],
                preferred_element_type=jnp.float32)           # (TB*L, K)
    s = s.reshape(TB, L, KSIZE)
    tap_l = s[:, :, 0]                   # contributes at position l+1
    tap_m = s[:, :, 1]
    tap_r = s[:, :, 2]                   # contributes at position l-1
    zcol = jnp.zeros((TB, 1), jnp.float32)
    out = (tap_m
           + jnp.concatenate([zcol, tap_l[:, :L - 1]], axis=1)
           + jnp.concatenate([tap_r[:, 1:], zcol], axis=1)
           + b2_ref[0, 0])
    out_ref[...] = out


def _pick_tb(B, L):
    """Batch-tile size: fill the MXU M dim while keeping f32 intermediates small."""
    cap = max(1, 4096 // max(L, 1))      # <= ~4k rows/step (few MB of f32 temps)
    if B <= cap:
        return B
    for tb in range(min(B, cap), 0, -1):
        if B % tb == 0 and tb % 8 == 0:  # keep sublane-aligned block in last-2 dims
            return tb
    return B                             # fall back: whole batch in one block


def convlstm1d_forward(x, params, *, mxu_dtype=jnp.float32):
    """x: (B, Cin, L) float32, PyTorch NCW convention. Returns (B, L) float32.

    mxu_dtype: operand dtype for the two MXU matmuls (jnp.bfloat16 recommended on
    v6e/v7x); accumulation and all gate math stay in float32.
    """
    B, Cin, L = x.shape
    H = HIDDEN
    K = KSIZE

    w1, b1, w2, b2 = params["w1"], params["b1"], params["w2"], params["b2"]

    # ---- exploit h0 == c0 == 0 in the weight prep ----
    # keep only the x-columns of the LSTM conv weight and drop the (unused)
    # forget-gate rows: i / o / g only -> (3H, Cin, K)
    w1_iog = jnp.concatenate([w1[0:H], w1[2 * H:3 * H], w1[3 * H:4 * H]], axis=0)
    w1_x = w1_iog[:, :Cin, :]                                   # (3H, Cin, K)
    w1_c = jnp.transpose(w1_x, (2, 1, 0)).reshape(K * Cin, 3 * H)   # (K*Cin, 3H)
    b1_iog = jnp.concatenate(
        [b1[0:H], b1[2 * H:3 * H], b1[3 * H:4 * H]]).reshape(1, 3 * H)
    w2_m = w2[0]                                                # (H, K)
    b2_r = b2.reshape(1, 1).astype(jnp.float32)                 # SMEM scalar

    # ---- im2col of x only (Cin is tiny; the 64 zero h-channels never touch HBM) ----
    x_cl = jnp.transpose(x, (0, 2, 1))                          # (B, L, Cin)
    xp = jnp.pad(x_cl, ((0, 0), (1, 1), (0, 0)))                # (B, L+2, Cin)
    x_cols = jnp.concatenate([xp[:, k:k + L, :] for k in range(K)], axis=-1)

    x_cols = x_cols.astype(mxu_dtype)
    w1_c = w1_c.astype(mxu_dtype)
    w2_m = w2_m.astype(mxu_dtype)
    b1_iog = b1_iog.astype(jnp.float32)

    TB = _pick_tb(B, L)
    # TODO(synk): for very large L, add an L-tiling grid axis with a +/-1 halo so
    # per-step VMEM stays inside v7x's 64 MiB and both v7x TensorCores get work.

    out = pl.pallas_call(
        convlstm_kernel,
        out_shape=jax.ShapeDtypeStruct((B, L), jnp.float32),
        grid_spec=pltpu.PrefetchScalarGridSpec(
            num_scalar_prefetch=0,
            grid=(B // TB,),
            in_specs=[
                pl.BlockSpec((TB, L, K * Cin), lambda b: (b, 0, 0)),
                pl.BlockSpec((K * Cin, 3 * H), lambda b: (0, 0)),
                pl.BlockSpec((1, 3 * H), lambda b: (0, 0)),
                pl.BlockSpec((H, K), lambda b: (0, 0)),
                pl.BlockSpec(memory_space=pltpu.MemorySpace.SMEM),
            ],
            out_specs=pl.BlockSpec((TB, L), lambda b: (b, 0)),
        ),
        compiler_params=pltpu.CompilerParams(
            dimension_semantics=("parallel",)),
    )(x_cols, w1_c, b1_iog, w2_m, b2_r)

    return out                                                  # (B, L)


def init_params(key, input_dim):
    """Deterministic params matching the PyTorch module's shapes/init scheme."""
    H = HIDDEN
    k1, k2, k3, k4 = jax.random.split(key, 4)
    fan1 = (input_dim + H) * KSIZE
    bound1 = 1.0 / jnp.sqrt(fan1)
    fan2 = H * KSIZE
    bound2 = 1.0 / jnp.sqrt(fan2)
    return {
        # Conv1d(input_dim+H -> 4H, k=3): weight (4H, Cin+H, K), bias (4H,)
        "w1": jax.random.uniform(k1, (4 * H, input_dim + H, KSIZE),
                                 jnp.float32, -bound1, bound1),
        "b1": jax.random.uniform(k2, (4 * H,), jnp.float32, -bound1, bound1),
        # Conv1d(H -> 1, k=3): weight (1, H, K), bias (1,)
        "w2": jax.random.uniform(k3, (1, H, KSIZE),
                                 jnp.float32, -bound2, bound2),
        "b2": jax.random.uniform(k4, (1,), jnp.float32, -bound2, bound2),
    }


def reference_forward(x, params):
    """Pure-JAX (lax.conv) reference of the PyTorch forward, for checking."""
    B, Cin, L = x.shape
    H = HIDDEN
    h0 = jnp.zeros((B, H, L), jnp.float32)
    c0 = jnp.zeros((B, H, L), jnp.float32)
    comb = jnp.concatenate([x, h0], axis=1)
    conv1 = lax.conv_general_dilated(
        comb, params["w1"], window_strides=(1,), padding=((1, 1),),
        dimension_numbers=("NCH", "OIH", "NCH")) + params["b1"][None, :, None]
    cc_i, cc_f, cc_o, cc_g = jnp.split(conv1, 4, axis=1)
    gi, gf, go = jax.nn.sigmoid(cc_i), jax.nn.sigmoid(cc_f), jax.nn.sigmoid(cc_o)
    gg = jnp.tanh(cc_g)
    c1 = gf * c0 + gi * gg
    h1 = go * jnp.tanh(c1)
    conv2 = lax.conv_general_dilated(
        h1, params["w2"], window_strides=(1,), padding=((1, 1),),
        dimension_numbers=("NCH", "OIH", "NCH")) + params["b2"][None, :, None]
    return conv2[:, 0, :]


if __name__ == "__main__":
    B, INPUT_DIM, L = 2, 4, 16

    key = jax.random.PRNGKey(0)
    kx, kp = jax.random.split(key)
    x = jax.random.normal(kx, (B, INPUT_DIM, L), jnp.float32)
    params = init_params(kp, INPUT_DIM)

    ref = reference_forward(x, params)

    # f32 MXU operands (v5e-safe, strict check)
    out = jax.block_until_ready(jax.jit(convlstm1d_forward)(x, params))
    assert out.shape == (B, L)
    assert jnp.allclose(out, ref, atol=1e-3, rtol=1e-3), (
        f"f32 max abs err {jnp.max(jnp.abs(out - ref))}")

    # bf16 MXU operands (v6e/v7x path): f32 accumulation + f32 gate math
    out_bf16 = jax.block_until_ready(
        jax.jit(lambda xx, pp: convlstm1d_forward(
            xx, pp, mxu_dtype=jnp.bfloat16))(x, params))
    assert jnp.allclose(out_bf16, ref, atol=2e-2, rtol=2e-2), (
        f"bf16 max abs err {jnp.max(jnp.abs(out_bf16 - ref))}")

    print("KERNEL_OK")
</pallas_src>

<mosaic_0001>
module attributes {stable_mosaic.version = 11 : i64} {
  func.func @convlstm_kernel(%arg0: i32, %arg1: memref<2x16x12xf32, #tpu.memory_space<vmem>>, %arg2: memref<12x192xf32, #tpu.memory_space<vmem>>, %arg3: memref<1x192xf32, #tpu.memory_space<vmem>>, %arg4: memref<64x3xf32, #tpu.memory_space<vmem>>, %arg5: memref<1x1xf32, #tpu.memory_space<smem>>, %arg6: memref<2x16xf32, #tpu.memory_space<vmem>>) attributes {dimension_semantics = [#tpu.dimension_semantics<parallel>], iteration_bounds = array<i64: 1>, scalar_prefetch = 0 : i64, scratch_operands = 0 : i64, tpu.core_type = #tpu.core_type<tc>, window_params = [{transform_indices = @transform_0, window_bounds = array<i64: 2, 16, 12>}, {pipeline_mode = #tpu.pipeline_mode<synchronous>, transform_indices = @transform_1, window_bounds = array<i64: 12, 192>}, {pipeline_mode = #tpu.pipeline_mode<synchronous>, transform_indices = @transform_2, window_bounds = array<i64: 1, 192>}, {pipeline_mode = #tpu.pipeline_mode<synchronous>, transform_indices = @transform_3, window_bounds = array<i64: 64, 3>}, {transform_indices = @transform_4, window_bounds = array<i64: 1, 1>}, {transform_indices = @transform_5, window_bounds = array<i64: 2, 16>}]} {
    %c0 = arith.constant 0 : index
    %c0_0 = arith.constant 0 : index
    %c0_1 = arith.constant 0 : index
    %0 = vector.load %arg1[%c0, %c0_0, %c0_1] : memref<2x16x12xf32, #tpu.memory_space<vmem>>, vector<2x16x12xf32>
    %1 = vector.shape_cast %0 : vector<2x16x12xf32> to vector<32x12xf32>
    %c0_2 = arith.constant 0 : index
    %c0_3 = arith.constant 0 : index
    %2 = vector.load %arg2[%c0_2, %c0_3] : memref<12x192xf32, #tpu.memory_space<vmem>>, vector<12x192xf32>
    %cst = arith.constant dense<0.000000e+00> : vector<32x192xf32>
    %3 = tpu.matmul %1, %2, %cst {dimension_numbers = #tpu.dot_dimension_numbers<[1], [0], [0], [1], [0, 0, 1, 1], [], []>} : vector<32x12xf32>, vector<12x192xf32>, vector<32x192xf32> -> vector<32x192xf32>
    %c0_4 = arith.constant 0 : index
    %c0_5 = arith.constant 0 : index
    %4 = vector.load %arg3[%c0_4, %c0_5] : memref<1x192xf32, #tpu.memory_space<vmem>>, vector<1x192xf32>
    %5 = vector.broadcast %4 : vector<1x192xf32> to vector<32x192xf32>
    %6 = arith.addf %3, %5 : vector<32x192xf32>
    %7 = vector.extract_strided_slice %6 {offsets = [0, 0], sizes = [32, 64], strides = [1, 1]} : vector<32x192xf32> to vector<32x64xf32>
    %cst_6 = arith.constant 5.000000e-01 : f32
    %8 = vector.broadcast %cst_6 : f32 to vector<32x64xf32>
    %9 = arith.mulf %8, %7 : vector<32x64xf32>
    %10 = math.tanh %9 : vector<32x64xf32>
    %cst_7 = arith.constant 5.000000e-01 : f32
    %11 = vector.broadcast %cst_7 : f32 to vector<32x64xf32>
    %12 = arith.mulf %11, %10 : vector<32x64xf32>
    %cst_8 = arith.constant 5.000000e-01 : f32
    %13 = vector.broadcast %cst_8 : f32 to vector<32x64xf32>
    %14 = arith.addf %12, %13 : vector<32x64xf32>
    %15 = vector.extract_strided_slice %6 {offsets = [0, 64], sizes = [32, 64], strides = [1, 1]} : vector<32x192xf32> to vector<32x64xf32>
    %cst_9 = arith.constant 5.000000e-01 : f32
    %16 = vector.broadcast %cst_9 : f32 to vector<32x64xf32>
    %17 = arith.mulf %16, %15 : vector<32x64xf32>
    %18 = math.tanh %17 : vector<32x64xf32>
    %cst_10 = arith.constant 5.000000e-01 : f32
    %19 = vector.broadcast %cst_10 : f32 to vector<32x64xf32>
    %20 = arith.mulf %19, %18 : vector<32x64xf32>
    %cst_11 = arith.constant 5.000000e-01 : f32
    %21 = vector.broadcast %cst_11 : f32 to vector<32x64xf32>
    %22 = arith.addf %20, %21 : vector<32x64xf32>
    %23 = vector.extract_strided_slice %6 {offsets = [0, 128], sizes = [32, 64], strides = [1, 1]} : vector<32x192xf32> to vector<32x64xf32>
    %24 = math.tanh %23 : vector<32x64xf32>
    %25 = arith.mulf %14, %24 : vector<32x64xf32>
    %26 = math.tanh %25 : vector<32x64xf32>
    %27 = arith.mulf %22, %26 : vector<32x64xf32>
    %c0_12 = arith.constant 0 : index
    %c0_13 = arith.constant 0 : index
    %28 = vector.load %arg4[%c0_12, %c0_13] : memref<64x3xf32, #tpu.memory_space<vmem>>, vector<64x3xf32>
    %cst_14 = arith.constant dense<0.000000e+00> : vector<32x3xf32>
    %29 = tpu.matmul %27, %28, %cst_14 {dimension_numbers = #tpu.dot_dimension_numbers<[1], [0], [0], [1], [0, 0, 1, 1], [], []>} : vector<32x64xf32>, vector<64x3xf32>, vector<32x3xf32> -> vector<32x3xf32>
    %30 = vector.shape_cast %29 : vector<32x3xf32> to vector<2x16x3xf32>
    %31 = vector.extract_strided_slice %30 {offsets = [0, 0, 0], sizes = [2, 16, 1], strides = [1, 1, 1]} : vector<2x16x3xf32> to vector<2x16x1xf32>
    %32 = vector.shape_cast %31 : vector<2x16x1xf32> to vector<2x16xf32>
    %33 = vector.extract_strided_slice %30 {offsets = [0, 0, 1], sizes = [2, 16, 1], strides = [1, 1, 1]} : vector<2x16x3xf32> to vector<2x16x1xf32>
    %34 = vector.shape_cast %33 : vector<2x16x1xf32> to vector<2x16xf32>
    %35 = vector.extract_strided_slice %30 {offsets = [0, 0, 2], sizes = [2, 16, 1], strides = [1, 1, 1]} : vector<2x16x3xf32> to vector<2x16x1xf32>
    %36 = vector.shape_cast %35 : vector<2x16x1xf32> to vector<2x16xf32>
    %cst_15 = arith.constant 0.000000e+00 : f32
    %37 = vector.broadcast %cst_15 : f32 to vector<2x1xf32>
    %38 = vector.extract_strided_slice %32 {offsets = [0, 0], sizes = [2, 15], strides = [1, 1]} : vector<2x16xf32> to vector<2x15xf32>
    %39 = tpu.concatenate %37, %38 in 1 : vector<2x1xf32>, vector<2x15xf32> -> vector<2x16xf32>
    %40 = arith.addf %34, %39 : vector<2x16xf32>
    %41 = vector.extract_strided_slice %36 {offsets = [0, 1], sizes = [2, 15], strides = [1, 1]} : vector<2x16xf32> to vector<2x15xf32>
    %42 = tpu.concatenate %41, %37 in 1 : vector<2x15xf32>, vector<2x1xf32> -> vector<2x16xf32>
    %43 = arith.addf %40, %42 : vector<2x16xf32>
    %c0_16 = arith.constant 0 : index
    %c0_17 = arith.constant 0 : index
    %44 = memref.load %arg5[%c0_16, %c0_17] : memref<1x1xf32, #tpu.memory_space<smem>>
    %45 = vector.broadcast %44 : f32 to vector<2x16xf32>
    %46 = arith.addf %43, %45 : vector<2x16xf32>
    %c0_18 = arith.constant 0 : index
    %c0_19 = arith.constant 0 : index
    %47 = vector.load %arg6[%c0_18, %c0_19] : memref<2x16xf32, #tpu.memory_space<vmem>>, vector<2x16xf32>
    tpu.vector_store %arg6[%c0_18, %c0_19], %46 {strides = array<i32>} : memref<2x16xf32, #tpu.memory_space<vmem>>, vector<2x16xf32>,
    return
  }
  func.func @transform_0(%arg0: i32) -> (i32, i32, i32) {
    %c0_i32 = arith.constant 0 : i32
    %c0_i32_0 = arith.constant 0 : i32
    %c0_i32_1 = arith.constant 0 : i32
    return %arg0, %c0_i32, %c0_i32_0 : i32, i32, i32
  }
  func.func @transform_1(%arg0: i32) -> (i32, i32) {
    %c0_i32 = arith.constant 0 : i32
    %c0_i32_0 = arith.constant 0 : i32
    %c0_i32_1 = arith.constant 0 : i32
    return %c0_i32, %c0_i32_0 : i32, i32
  }
  func.func @transform_2(%arg0: i32) -> (i32, i32) {
    %c0_i32 = arith.constant 0 : i32
    %c0_i32_0 = arith.constant 0 : i32
    %c0_i32_1 = arith.constant 0 : i32
    return %c0_i32, %c0_i32_0 : i32, i32
  }
  func.func @transform_3(%arg0: i32) -> (i32, i32) {
    %c0_i32 = arith.constant 0 : i32
    %c0_i32_0 = arith.constant 0 : i32
    %c0_i32_1 = arith.constant 0 : i32
    return %c0_i32, %c0_i32_0 : i32, i32
  }
  func.func @transform_4(%arg0: i32) -> (i32, i32) {
    %c0_i32 = arith.constant 0 : i32
    %c0_i32_0 = arith.constant 0 : i32
    %c0_i32_1 = arith.constant 0 : i32
    return %c0_i32, %c0_i32_0 : i32, i32
  }
  func.func @transform_5(%arg0: i32) -> (i32, i32) {
    %c0_i32 = arith.constant 0 : i32
    %c0_i32_0 = arith.constant 0 : i32
    return %arg0, %c0_i32 : i32, i32
  }
}

</mosaic_0001>

<bundles_post_ra>
// kernel: convlstm1d_forward.1
= control target key start
LH: loop header
LB: loop body
LE: loop exit
PB: predicated region body
PF: predicated region fallthrough
CT: control target
= control target key end

     0   :  { %vm55_vm0 = vcmask 1043456   ;;  %v621_v4 = vmov 0.0   ;;  %vm42_vm1 = vcmask 97280   ;;  %s774_s0 = inlined_call_operand.vmem [shape: f32[2,16,12], index: 0, kind: input, shape index: {}]   ;;  %s775_s1 = inlined_call_operand.vmem [shape: f32[12,192], index: 1, kind: input, shape index: {}]   ;;  %s776_s2 = inlined_call_operand.vmem [shape: f32[1,192], index: 2, kind: input, shape index: {}]   ;;  %s777_s3 = inlined_call_operand.vmem [shape: f32[64,3], index: 3, kind: input, shape index: {}]   ;;  %s778_s4 = inlined_call_operand.<no memory space> [shape: f32[1,1], index: 4, kind: input, shape index: {}]   ;;  %s779_s5 = inlined_call_operand.hbm [shape: f32[2,16], index: 5, kind: output, shape index: {}]  }
   0x1   :  { %v29_v0 = vld [vmem:[%s775_s1 + $0x18] sm:$0xf]  ;;  %v28_v1 = vld [vmem:[%s775_s1 + $0x10] sm:$0xf]  ;;  %v27_v2 = vld [vmem:[%s775_s1 + $0x8] sm:$0xff]  ;;  %126 = vmatprep.mubr.f32.mxu0 %v621_v4 }
   0x2   :  { %517 = vmatprep.subr.msk.mxu0 %vm55_vm0, %v29_v0  ;;  %v26_v3 = vld [vmem:[%s775_s1] sm:$0xff] }
   0x3   :  { %518 = vmatpush1.msk.msra.mxu0 %vm55_vm0, %v28_v1  ;;  %v22_v5 = vld [vmem:[%s774_s0] sm:$0xff] }
   0x4   :  { %92 = vmatprep.subr.mxu0 %v27_v2 }
   0x5   :  { %11 = vsyncpa [#allocation4], 0  ;;  %93 = vmatpush1.msra.mxu0 %v26_v3  ;;  %v23_v6 = vld [vmem:[%s774_s0 + $0x8] sm:$0xff]  ;;  %v24_v7 = vld [vmem:[%s774_s0 + $0x10] sm:$0xff]  ;;  %v32_v9 = vlaneseq  ;;  %vm219_vm2 = vcmask 523264   ;;  %vm341_vm3 = vcmask 138312  }
   0x6   :  { %519 = vmatmul.mubr.msk.f32.vlgmr.msra.gmra.mxu0 %vm42_vm1, %v22_v5  ;;  %v25_v8 = vld [vmem:[%s774_s0 + $0x18] sm:$0xff]  ;;  %v30_v12 = vld [vmem:[%s776_s2] sm:$0x3]  ;;  %s622_s0 = smov 64   ;;  %v205_v58 = vld [vmem:[%s777_s3 + $0x30] sm:$0xff]  ;;  %vm352_vm4 = vcmask 1041409  }
   0x7   :  { %132 = vmatprep.mubr.f32.mxu0 %v621_v4  ;;  %v682_v10 = vshrl.u32 %v32_v9, 7  ;;  %v206_v57 = vld [vmem:[%s777_s3 + $0x38] sm:$0xff]  ;;  %v204_v60 = vld [vmem:[%s777_s3 + $0x28] sm:$0xff]  ;;  %v203_v61 = vld [vmem:[%s777_s3 + $0x20] sm:$0xff]  ;;  %vm355_vm5 = vcmask 7168   ;;  %vm410_vm6 = vcmask 121912  }
   0x8   :  { %539 = vmatprep.subr.mxu1 %v206_v57  ;;  %v202_v63 = vld [vmem:[%s777_s3 + $0x18] sm:$0xff]  ;;  %v201_v0 = vld [vmem:[%s777_s3 + $0x10] sm:$0xff]  ;;  %v200_v2 = vld [vmem:[%s777_s3 + $0x8] sm:$0xff]  ;;  %vm421_vm7 = vcmask 1042434   ;;  %vm424_vm8 = vcmask 121856   ;;  %vm488_vm9 = vcmask 130112  }
   0x9   :  { %v34_v11 = vsub.s32 0, %v682_v10  ;;  %v689_v13 = vsub.s32 1, %v682_v10  ;;  %540 = vmatpush3.msra.mxu1 %v206_v57  ;;  %v199_v3 = vld [vmem:[%s777_s3] sm:$0xff]  ;;  %vm501_vm10 = vcmask 123904  }
   0xa   :  { %520 = vmatmul.mubr.msk.f32.gmra.mxu0 %vm42_vm1, %v23_v6  ;;  %541 = vmatprep.subr.mxu1 %v205_v58  ;;  %v623_v6 = vmov 0  }
   0xb   :  { %138 = vmatprep.mubr.f32.mxu0 %v621_v4  ;;  %v35_v14 = vrot.slane %v30_v12, %v34_v11  ;;  %v39_v16 = vrot.slane %v30_v12, %v689_v13  ;;  %542 = vmatpush3.msra.mxu1 %v205_v58 }
   0xc   :  { %543 = vmatprep.subr.mxu1 %v204_v60  ;;  %567 = vset.pattern.permute.xlu1 %v623_v6 }
   0xd   :  { %544 = vmatpush3.msra.mxu1 %v204_v60  ;;  %568 = vset.pattern.permute.xlu0 %v623_v6 }
   0xe   :  { %521 = vmatmul.mubr.msk.f32.gmra.mxu0 %vm42_vm1, %v24_v7  ;;  %545 = vmatprep.subr.mxu1 %v203_v61 }
   0xf   :  { %144 = vmatprep.mubr.f32.mxu0 %v621_v4  ;;  %546 = vmatpush3.msra.mxu1 %v203_v61  ;;  %v440_v61 = vsub.s32 2, %v682_v10 }
  0x10   :  { %547 = vmatprep.subr.mxu1 %v202_v63 }
  0x11   :  { %548 = vmatpush3.msra.mxu1 %v202_v63 }
  0x12   :  { %522 = vmatmul.mubr.msk.f32.gmra.mxu0 %vm42_vm1, %v25_v8  ;;  %549 = vmatprep.subr.mxu1 %v201_v0 }
  0x13   :  { %550 = vmatpush3.msra.mxu1 %v201_v0 }
  0x14   :  { %551 = vmatprep.subr.mxu1 %v200_v2 }
  0x15   :  { %552 = vmatpush3.msra.mxu1 %v200_v2 }
  0x16   :  { %553 = vmatprep.subr.mxu1 %v199_v3 }
  0x17   :  { %554 = vmatpush3.msra.mxu1 %v199_v3 }
  0xc6   :  { %v128_v15 = vpop.f32.mrf.mxu0 }
  0xc7   :  { %v129_v17 = vadd.f32 %v128_v15, %v35_v14 }
  0xc8   :  { %v130_v18 = vpop.f32.mrf.mxu0 }
  0xc9   :  { %v151_v19 = vmul.f32 0.5, %v129_v17  ;;  %v131_v20 = vadd.f32 %v130_v18, %v39_v16 }
  0xca   :  { %v134_v21 = vpop.f32.mrf.mxu0 }
  0xcb   :  { %575 = vtanh.f32 %v151_v19  ;;  %v135_v22 = vadd.f32 %v134_v21, %v35_v14 }
  0xcc   :  { %v136_v23 = vpop.f32.mrf.mxu0  ;;  %577 = vtanh.f32 %v131_v20 }
  0xcd   :  { %v152_v24 = vmul.f32 0.5, %v135_v22  ;;  %v137_v25 = vadd.f32 %v136_v23, %v39_v16  ;;  %v624_v23 = vmov 2  }
  0xce   :  { %v140_v26 = vpop.f32.mrf.mxu0 }
  0xcf   :  { %579 = vtanh.f32 %v152_v24  ;;  %v141_v27 = vadd.f32 %v140_v26, %v35_v14  ;;  %v743_v26 = vand.u32 127, %v32_v9 }
  0xd0   :  { %v142_v28 = vpop.f32.mrf.mxu0  ;;  %581 = vtanh.f32 %v137_v25 }
  0xd1   :  { %v153_v29 = vmul.f32 0.5, %v141_v27  ;;  %v143_v30 = vadd.f32 %v142_v28, %v39_v16  ;;  %v331_v28 = vadd.s32 4294967295, %v743_v26 }
  0xd2   :  { %v146_v31 = vpop.f32.mrf.mxu0 }
  0xd3   :  { %583 = vtanh.f32 %v153_v29  ;;  %v147_v32 = vadd.f32 %v146_v31, %v35_v14  ;;  %v336_v29 = vadd.s32 4294967287, %v743_v26  ;;  %v334_v31 = vsub.s32 %v331_v28, %v682_v10 }
  0xd4   :  { %v148_v33 = vpop.f32.mrf.mxu0  ;;  %585 = vtanh.f32 %v143_v30 }
  0xd5   :  { %v154_v34 = vmul.f32 0.5, %v147_v32  ;;  %v149_v35 = vadd.f32 %v148_v33, %v39_v16  ;;  %v339_v33 = vsub.s32 %v336_v29, %v682_v10 }
  0xd7   :  { %587 = vtanh.f32 %v154_v34 }
  0xd8   :  { %v576_v36 = vpop.eup %575  ;;  %589 = vtanh.f32 %v149_v35 }
  0xd9   :  { %v159_v37 = vmul.f32 0.5, %v576_v36  ;;  %v578_v38 = vpop.eup %577 }
  0xdb   :  { %v163_v39 = vadd.f32 0.5, %v159_v37  ;;  %v405_v37 = vadd.s32 4294967289, %v743_v26 }
  0xdc   :  { %v580_v40 = vpop.eup %579 }
  0xdd   :  { %v160_v41 = vmul.f32 0.5, %v580_v40  ;;  %v171_v42 = vmul.f32 %v578_v38, %v163_v39  ;;  %v582_v43 = vpop.eup %581  ;;  %v400_v40 = vadd.s32 1, %v743_v26 }
  0xdf   :  { %v164_v44 = vadd.f32 0.5, %v160_v41  ;;  %591 = vtanh.f32 %v171_v42 }
  0xe0   :  { %v584_v45 = vpop.eup %583 }
  0xe1   :  { %v172_v46 = vmul.f32 %v582_v43, %v164_v44  ;;  %v161_v47 = vmul.f32 0.5, %v584_v45  ;;  %v586_v48 = vpop.eup %585  ;;  %v408_v43 = vsub.s32 %v405_v37, %v682_v10 }
  0xe3   :  { %593 = vtanh.f32 %v172_v46  ;;  %v165_v49 = vadd.f32 0.5, %v161_v47 }
  0xe4   :  { %v588_v50 = vpop.eup %587 }
  0xe5   :  { %v162_v51 = vmul.f32 0.5, %v588_v50  ;;  %v173_v52 = vmul.f32 %v586_v48, %v165_v49  ;;  %v590_v54 = vpop.eup %589  ;;  %v403_v48 = vsub.s32 %v400_v40, %v682_v10 }
  0xe7   :  { %v166_v53 = vadd.f32 0.5, %v162_v51  ;;  %595 = vtanh.f32 %v173_v52  ;;  %v625_v52 = vmov 1  }
  0xe9   :  { %v174_v55 = vmul.f32 %v590_v54, %v166_v53 }
  0xeb   :  { %597 = vtanh.f32 %v174_v55 }
  0xec   :  { %v592_v56 = vpop.eup %591 }
  0xed   :  { %183 = vrot.lane.b32.xlu0 %v592_v56, %s622_s0 }
  0xf0   :  { %v594_v59 = vpop.eup %593 }
  0xf1   :  { %185 = vrot.lane.b32.xlu0 %v594_v59, %s622_s0 }
  0xf4   :  { %v596_v62 = vpop.eup %595 }
  0xf5   :  { %187 = vrot.lane.b32.xlu1 %v596_v62, %s622_s0 }
  0xf8   :  { %v598_v1 = vpop.eup %597 }
  0xf9   :  { %189 = vrot.lane.b32.xlu1 %v598_v1, %s622_s0 }
 0x15f   :  { %v184_v4 = vpop.permute.xlu0 %183 }
 0x160   :  { %v195_v5 = vmul.f32 %v184_v4, %v163_v39 }
 0x162   :  { %211 = vrot.lane.b32.xlu0 %v195_v5, %s622_s0  ;;  %v458_v5 = vstv %s778_s4  ;;  %s626_s4 = smov [#allocation3]  }
 0x163   :  { %v186_v7 = vpop.permute.xlu0 %185  ;;  %s509_s26 = sshll.u32 %s626_s4, 4  ;;  %s510_s26 = int_to_ptr.vmem [resolvable:$true] %s509_s26 }
 0x164   :  { %v196_v8 = vmul.f32 %v186_v7, %v164_v44  ;;  %s599_s27 = scalar_lea.vmem %s510_s26, 32  ;;  %p604_p1 = scmp.lt.s32.totalorder %s510_s26, %s510_s26 }
 0x165   :  { %p600_p0 = scmp.ne.s32.totalorder %s510_s26, %s599_s27  ;;  %p605_p2 = scmp.lt.s32.totalorder %s599_s27, %s599_s27 }
 0x166   :  { %213 = vrot.lane.b32.xlu1 %v196_v8, %s622_s0 }
 0x167   :  { %v188_v12 = vpop.permute.xlu1 %187  ;;  %p606_p3 = por %p605_p2, %p604_p1 }
 0x168   :  { %v197_v14 = vmul.f32 %v188_v12, %v165_v49 }
 0x169   :  { %p607_p4 = pnand %p606_p3, %p600_p0 }
 0x16a   :  { %215 = vrot.lane.b32.xlu0 %v197_v14, %s622_s0 }
 0x16b   :  { %v190_v15 = vpop.permute.xlu1 %189 }
 0x16c   :  { %v198_v16 = vmul.f32 %v190_v15, %v166_v53 }
 0x16e   :  { %217 = vrot.lane.b32.xlu1 %v198_v16, %s622_s0 }
 0x1d4   :  { %v212_v17 = vpop.permute.xlu0 %211 }
 0x1d5   :  { %555 = vmatprep.mubr.msk.f32.mxu1 %vm219_vm2, %v212_v17 }
 0x1d8   :  { %v214_v18 = vpop.permute.xlu1 %213 }
 0x1d9   :  { %556 = vmatmul.mubr.msk.f32.vlgmr.msra.gmra.mxu1 %vm219_vm2, %v214_v18 }
 0x1dc   :  { %v216_v19 = vpop.permute.xlu0 %215 }
 0x1dd   :  { %558 = vmatprep.mubr.msk.f32.mxu1 %vm219_vm2, %v216_v19 }
 0x1e0   :  { %v218_v20 = vpop.permute.xlu1 %217 }
 0x1e1   :  { %559 = vmatmul.mubr.msk.f32.gmra.mxu1 %vm219_vm2, %v218_v20 }
 0x299   :  { %v726_v21 = vpop.f32.mrf.mxu1 }
 0x29a   :  { %321 = vperm.xlu1 %567, %v726_v21  }
 0x29b   :  { %v729_v22 = vpop.f32.mrf.mxu1 }
 0x29c   :  { %318 = vperm.xlu0 %568, %v729_v22  }
 0x29e   :  { %569 = vset.pattern.permute.xlu1 %v624_v23 }
 0x29f   :  { %389 = vperm.xlu1 %569, %v729_v22  }
 0x2a1   :  { %v733_v24 = vpop.f32.mrf.mxu1 }
 0x2a2   :  { %327 = vperm.xlu0 %568, %v733_v24  }
 0x2a3   :  { %571 = vset.pattern.permute.xlu1 %v623_v6  ;;  %v736_v25 = vpop.f32.mrf.mxu1 }
 0x2a4   :  { %324 = vperm.xlu1 %571, %v736_v25  }
 0x2a6   :  { %570 = vset.pattern.permute.xlu0 %v624_v23 }
 0x2a7   :  { %392 = vperm.xlu0 %570, %v726_v21  }
 0x2a8   :  { %572 = vset.pattern.permute.xlu1 %v624_v23  ;;  %v483_v23 = vadd.s32 4294967288, %v743_v26 }
 0x2a9   :  { %395 = vperm.xlu1 %572, %v736_v25  }
 0x2ab   :  { %573 = vset.pattern.permute.xlu0 %v625_v52 }
 0x2ad   :  { %398 = vperm.xlu1 %572, %v733_v24  }
 0x2b1   :  { %574 = vset.pattern.permute.xlu1 %v625_v52 }
 0x315   :  { %v322_v27 = vpop.permute.xlu1 %321 }
 0x316   :  { %v340_v38 = vrot.slane %v322_v27, %v339_v33  ;;  %v486_v27 = vsub.s32 %v483_v23, %v682_v10 }
 0x317   :  { %v319_v30 = vpop.permute.xlu0 %318 }
 0x318   :  { %v335_v35 = vrot.slane %v319_v30, %v334_v31 }
 0x31a   :  { %v390_v32 = vpop.permute.xlu1 %389  ;;  %v342_v41 = vsel %vm341_vm3, %v340_v38, %v335_v35 }
 0x31b   :  { %v404_v53 = vrot.slane %v390_v32, %v403_v48 }
 0x31d   :  { %v328_v34 = vpop.permute.xlu0 %327 }
 0x31e   :  { %v350_v9 = vrot.slane %v328_v34, %v339_v33 }
 0x31f   :  { %v325_v36 = vpop.permute.xlu1 %324 }
 0x320   :  { %v346_v39 = vrot.slane %v325_v36, %v334_v31 }
 0x322   :  { %v351_v42 = vsel %vm341_vm3, %v350_v9, %v346_v39  ;;  %v393_v45 = vpop.permute.xlu0 %392 }
 0x323   :  { %v353_v44 = vsel %vm352_vm4, %v351_v42, %v342_v41  ;;  %v409_v50 = vrot.slane %v393_v45, %v408_v43 }
 0x324   :  { %v396_v46 = vpop.permute.xlu1 %395  ;;  %v356_v47 = vsel %vm355_vm5, 0.0, %v353_v44 }
 0x325   :  { %v361_v49 = vrot.slane %v356_v47, %v34_v11  ;;  %v415_v54 = vrot.slane %v396_v46, %v403_v48  ;;  %v372_v56 = vrot.slane %v356_v47, %v689_v13  ;;  %v411_v57 = vsel %vm410_vm6, %v409_v50, %v404_v53 }
 0x327   :  { %367 = vbcast.lane.b32.xlu1 %v361_v49, 264  ;;  %363 = vbcast.lane.b32.xlu0 %v361_v49, 256 }
 0x328   :  { %v399_v51 = vpop.permute.xlu1 %398 }
 0x329   :  { %v419_v55 = vrot.slane %v399_v51, %v408_v43 }
 0x32b   :  { %v420_v58 = vsel %vm410_vm6, %v419_v55, %v415_v54  ;;  %378 = vbcast.lane.b32.xlu1 %v372_v56, 264  ;;  %374 = vbcast.lane.b32.xlu0 %v372_v56, 256 }
 0x32c   :  { %v422_v11 = vsel %vm421_vm7, %v420_v58, %v411_v57 }
 0x32d   :  { %v425_v59 = vsel %vm424_vm8, %v422_v11, 0.0 }
 0x32e   :  { %v430_v60 = vrot.slane %v425_v59, %v689_v13  ;;  %v441_v62 = vrot.slane %v425_v59, %v440_v61 }
 0x330   :  { %436 = vbcast.lane.b32.xlu1 %v430_v60, 264  ;;  %432 = vbcast.lane.b32.xlu0 %v430_v60, 256 }
 0x334   :  { %447 = vbcast.lane.b32.xlu1 %v441_v62, 264  ;;  %443 = vbcast.lane.b32.xlu0 %v441_v62, 256 }
 0x399   :  { %v368_v63 = vpop.permute.xlu1 %367  ;;  %v364_v0 = vpop.permute.xlu0 %363 }
 0x39a   :  { %v385_v3 = vadd.f32 %v726_v21, %v368_v63  ;;  %v384_v4 = vadd.f32 %v364_v0, %v729_v22 }
 0x39d   :  { %v379_v1 = vpop.permute.xlu1 %378  ;;  %v375_v2 = vpop.permute.xlu0 %374 }
 0x39e   :  { %v387_v12 = vadd.f32 %v733_v24, %v379_v1  ;;  %v386_v14 = vadd.f32 %v375_v2, %v736_v25  ;;  %v481_v24 = vsub.s32 %v743_v26, %v682_v10 }
 0x3a2   :  { %v437_v13 = vpop.permute.xlu1 %436  ;;  %v433_v6 = vpop.permute.xlu0 %432 }
 0x3a3   :  { %v454_v7 = vadd.f32 %v437_v13, %v385_v3  ;;  %v453_v8 = vadd.f32 %v433_v6, %v384_v4 }
 0x3a5   :  { %v460_v15 = vadd.f32 %v458_v5, %v454_v7  ;;  %v459_v16 = vadd.f32 %v458_v5, %v453_v8 }
 0x3a6   :  { %v448_v17 = vpop.permute.xlu1 %447  ;;  %v444_v18 = vpop.permute.xlu0 %443 }
 0x3a7   :  { %v456_v19 = vadd.f32 %v448_v17, %v387_v12  ;;  %v455_v20 = vadd.f32 %v444_v18, %v386_v14  ;;  %471 = vperm.xlu1 %574, %v460_v15   ;;  %468 = vperm.xlu0 %573, %v459_v16  }
 0x3a9   :  { %v462_v21 = vadd.f32 %v458_v5, %v456_v19  ;;  %v461_v22 = vadd.f32 %v458_v5, %v455_v20 }
 0x3ab   :  { %477 = vperm.xlu0 %573, %v462_v21   ;;  %474 = vperm.xlu1 %574, %v461_v22  }
 0x422   :  { %v472_v25 = vpop.permute.xlu1 %471  ;;  %v469_v28 = vpop.permute.xlu0 %468 }
 0x423   :  { %v487_v29 = vrot.slane %v472_v25, %v486_v27  ;;  %v482_v30 = vrot.slane %v469_v28, %v481_v24 }
 0x425   :  { %v489_v35 = vsel %vm488_vm9, %v487_v29, %v482_v30 }
 0x426   :  { %v475_v31 = vpop.permute.xlu1 %474  ;;  %v478_v32 = vpop.permute.xlu0 %477 }
 0x427   :  { %v493_v33 = vrot.slane %v475_v31, %v481_v24  ;;  %v497_v34 = vrot.slane %v478_v32, %v486_v27 }
 0x429   :  { %v498_v36 = vsel %vm488_vm9, %v497_v34, %v493_v33 }
 0x42a   :  { %v499_v37 = vsel %vm352_vm4, %v498_v36, %v489_v35 }
 0x42b   :  { %502 = vst.msk [vmem:[#allocation3] sm:$0x3] %vm501_vm10, %v499_v37 }
 0x42c   :  { %610 = shalt.err (!%p607_p4)
}
 0x42d   :  { %512 = dma.vmem_to_hbm [thread:$0]  %s510_s26, 32, %s779_s5, [#allocation4]  }
 0x42e   :  { %619 = dma.done.wait [#allocation4], 32  }
 0x42f   :  { %620 = vsyncadd [#allocation4], 4294967264 }
 0x430   :  { %516 = vsyncpa [#allocation4], 1 }

</bundles_post_ra>
